<compile_context>
chip_gen: v5e
topology: v5e:2x2
jax: 0.10.0
libtpu: 0.0.40
codegen_flags: <defaults>
</compile_context>

<pallas_src>
import jax
import jax.numpy as jnp
from jax.experimental import pallas as pl
from jax.experimental.pallas import tpu as pltpu

NUM_CLASSES = 5          # stand-in for len(class_names)
_NC_PAD = 128            # lane-dense output width (NUM_CLASSES padded to 128)
_LANE = 128
_SUBLANE = 8


def _round_up(n, m):
    return ((n + m - 1) // m) * m


def _mm(a, b):
    # High-precision matmul for offline weight folding / reference path.
    return jnp.dot(a, b, precision=jax.lax.Precision.HIGHEST)


# ---------------------------------------------------------------------------
# Kernel
# ---------------------------------------------------------------------------
def _mymodel_kernel(x_ref, s_ref, w_ref, b_ref, o_ref, acc_ref):
    """Grid = (batch_tiles, hw_tiles); the hw axis is the sequential reduction.

    x_ref   : (rows_tile, hw_tile)  tile of flattened (B*C, H*W) input
    s_ref   : (b_tile, rows_tile)   0/1 selection matrix (sums channels per batch)
    w_ref   : (rows_tile, 128)      fused head weight (replicated per batch row,
                                    1/(H*W) already folded in)
    b_ref   : (1, 128)              fused head bias (lane padded)
    o_ref   : (b_tile, 128)         lane-dense logits tile
    acc_ref : (rows_tile, 1)        running spatial sum (VMEM scratch)
    """
    j = pl.program_id(1)

    @pl.when(j == 0)
    def _init():
        acc_ref[...] = jnp.zeros_like(acc_ref)

    # Partial spatial sum for this tile (lane-axis reduce).
    acc_ref[...] += jnp.sum(x_ref[...], axis=-1, keepdims=True)

    @pl.when(j == pl.num_programs(1) - 1)
    def _finalize():
        # out[b, :] = sum_c mean[b, c] * W_fused[c, :] + bias  (all folded).
        p = acc_ref[...] * w_ref[...]                       # (rows_tile, 128)
        h = jnp.dot(s_ref[...], p,
                    preferred_element_type=jnp.float32)     # (b_tile, 128)
        o_ref[...] = (h + b_ref[...]).astype(o_ref.dtype)


# ---------------------------------------------------------------------------
# Wrapper
# ---------------------------------------------------------------------------
def mymodel_forward(x, params, *, b_tile_batches=8, max_hw_tile=16384):
    """x: (B, C, H, W) float32 NCHW. Returns (B, NUM_CLASSES) float32."""
    B, C, H, W = x.shape
    hw = H * W

    (ws, bs), (w1, b1), (w2, b2), (w3, b3) = params
    nc = w3.shape[1]
    assert nc <= _NC_PAD

    # ---- Fold the activation-free linear chain offline (exact in math) ----
    w_chain = _mm(_mm(_mm(ws, w1), w2), w3)                   # (C, nc)
    b_chain = _mm(_mm(_mm(bs, w1) + b1, w2) + b2, w3) + b3    # (1, nc)
    w_eff = w_chain * (1.0 / float(hw))                       # fold GAP mean

    # Lane-dense padding of the tiny fused head.
    w_pad = jnp.zeros((C, _NC_PAD), jnp.float32).at[:, :nc].set(w_eff)
    bias_pad = jnp.zeros((1, _NC_PAD), jnp.float32).at[:, :nc].set(b_chain)

    # ---- Tile selection ----------------------------------------------------
    b_tile = _round_up(min(b_tile_batches, B), _SUBLANE)      # multiple of 8
    rows_tile = b_tile * C                                    # multiple of 8 (C=3)
    rows = B * C
    rows_pad = C * _round_up(B, b_tile)
    b_out = rows_pad // C

    hw_pad = _round_up(hw, _LANE)
    m = hw_pad // _LANE
    d_max = max(1, min(m, max_hw_tile // _LANE))
    d = 1
    for cand in range(d_max, 0, -1):                          # largest divisor
        if m % cand == 0:
            d = cand
            break
    hw_tile = d * _LANE

    # ---- Layout plumbing (free reshape; zero-pad only when needed) --------
    x2 = x.reshape(rows, hw).astype(jnp.float32)
    if rows_pad != rows or hw_pad != hw:
        x2 = jnp.pad(x2, ((0, rows_pad - rows), (0, hw_pad - hw)))

    w_rep = jnp.tile(w_pad, (b_tile, 1))                      # (rows_tile, 128)
    b_idx = jnp.arange(b_tile, dtype=jnp.int32)[:, None]
    r_idx = jnp.arange(rows_tile, dtype=jnp.int32)[None, :]
    sel = (r_idx // C == b_idx).astype(jnp.float32)           # (b_tile, rows_tile)

    grid = (rows_pad // rows_tile, hw_pad // hw_tile)

    in_specs = [
        pl.BlockSpec((rows_tile, hw_tile), lambda i, j: (i, j)),
        pl.BlockSpec((b_tile, rows_tile), lambda i, j: (0, 0)),
        pl.BlockSpec((rows_tile, _NC_PAD), lambda i, j: (0, 0)),
        pl.BlockSpec((1, _NC_PAD), lambda i, j: (0, 0)),
    ]
    out_specs = pl.BlockSpec((b_tile, _NC_PAD), lambda i, j: (i, 0))

    cost = pl.CostEstimate(
        flops=2 * rows_pad * hw_pad + 2 * b_out * rows_tile * _NC_PAD,
        transcendentals=0,
        bytes_accessed=(rows_pad * hw_pad + b_out * _NC_PAD
                        + b_tile * rows_tile + rows_tile * _NC_PAD + _NC_PAD) * 4,
    )

    out = pl.pallas_call(
        _mymodel_kernel,
        out_shape=jax.ShapeDtypeStruct((b_out, _NC_PAD), jnp.float32),
        grid_spec=pltpu.PrefetchScalarGridSpec(
            num_scalar_prefetch=0,
            grid=grid,
            in_specs=in_specs,
            out_specs=out_specs,
            scratch_shapes=[pltpu.VMEM((rows_tile, 1), jnp.float32)],
        ),
        compiler_params=pltpu.CompilerParams(
            dimension_semantics=("parallel", "arbitrary"),
            vmem_limit_bytes=32 * 1024 * 1024,
        ),
        cost_estimate=cost,
    )(x2, sel, w_rep, bias_pad)

    return out[:B, :nc]


# ---------------------------------------------------------------------------
# Params + reference
# ---------------------------------------------------------------------------
def init_params(key, c_in=3, feat=1000, h1=16, h2=64, nc=NUM_CLASSES):
    """PyTorch-Linear-style init: U(-1/sqrt(fan_in), 1/sqrt(fan_in)).

    Weights stored pre-transposed as (in, out); biases as (1, out).
    """
    def linear(k, fan_in, fan_out):
        kw, kb = jax.random.split(k)
        bound = 1.0 / jnp.sqrt(jnp.float32(fan_in))
        w = jax.random.uniform(kw, (fan_in, fan_out), jnp.float32, -bound, bound)
        b = jax.random.uniform(kb, (1, fan_out), jnp.float32, -bound, bound)
        return w, b

    k0, k1, k2, k3 = jax.random.split(key, 4)
    return (
        linear(k0, c_in, feat),   # backbone stub projection
        linear(k1, feat, h1),     # fc1
        linear(k2, h1, h2),       # fc2
        linear(k3, h2, nc),       # fc3
    )


def reference_forward(x, params):
    """Pure-JAX reference with identical (un-fused) semantics."""
    (ws, bs), (w1, b1), (w2, b2), (w3, b3) = params
    feats = jnp.mean(x.reshape(x.shape[0], x.shape[1], -1), axis=-1)
    h = _mm(feats, ws) + bs
    h = _mm(h, w1) + b1
    h = _mm(h, w2) + b2
    h = _mm(h, w3) + b3
    return h


if __name__ == "__main__":
    key = jax.random.PRNGKey(0)
    kx, kp = jax.random.split(key)

    B, C, H, W = 2, 3, 16, 16
    x = jax.random.normal(kx, (B, C, H, W), dtype=jnp.float32)
    params = init_params(kp)

    out = mymodel_forward(x, params)
    out = jax.block_until_ready(out)

    ref = reference_forward(x, params)
    assert out.shape == (B, NUM_CLASSES), out.shape
    assert jnp.allclose(out, ref, atol=2e-3, rtol=2e-3), (out, ref)

    print("KERNEL_OK")
</pallas_src>

<mosaic_0001>
module attributes {stable_mosaic.version = 11 : i64} {
  func.func @_mymodel_kernel(%arg0: i32, %arg1: i32, %arg2: memref<24x256xf32, #tpu.memory_space<vmem>>, %arg3: memref<8x24xf32, #tpu.memory_space<vmem>>, %arg4: memref<24x128xf32, #tpu.memory_space<vmem>>, %arg5: memref<1x128xf32, #tpu.memory_space<vmem>>, %arg6: memref<8x128xf32, #tpu.memory_space<vmem>>, %arg7: memref<24x1xf32, #tpu.memory_space<vmem>>) attributes {dimension_semantics = [#tpu.dimension_semantics<parallel>, #tpu.dimension_semantics<arbitrary>], iteration_bounds = array<i64: 1, 1>, scalar_prefetch = 0 : i64, scratch_operands = 1 : i64, tpu.core_type = #tpu.core_type<tc>, window_params = [{transform_indices = @transform_0, window_bounds = array<i64: 24, 256>}, {pipeline_mode = #tpu.pipeline_mode<synchronous>, transform_indices = @transform_1, window_bounds = array<i64: 8, 24>}, {pipeline_mode = #tpu.pipeline_mode<synchronous>, transform_indices = @transform_2, window_bounds = array<i64: 24, 128>}, {pipeline_mode = #tpu.pipeline_mode<synchronous>, transform_indices = @transform_3, window_bounds = array<i64: 1, 128>}, {transform_indices = @transform_4, window_bounds = array<i64: 8, 128>}]} {
    %c0_i32 = arith.constant 0 : i32
    %0 = arith.cmpi eq, %arg1, %c0_i32 : i32
    %1 = arith.extui %0 : i1 to i32
    %c0_i32_0 = arith.constant 0 : i32
    %2 = arith.cmpi ne, %1, %c0_i32_0 : i32
    scf.if %2 {
      %cst_8 = arith.constant 0.000000e+00 : f32
      %12 = vector.broadcast %cst_8 : f32 to vector<24x1xf32>
      %c0_9 = arith.constant 0 : index
      %c0_10 = arith.constant 0 : index
      %13 = vector.load %arg7[%c0_9, %c0_10] : memref<24x1xf32, #tpu.memory_space<vmem>>, vector<24x1xf32>
      tpu.vector_store %arg7[%c0_9, %c0_10], %12 {strides = array<i32>} : memref<24x1xf32, #tpu.memory_space<vmem>>, vector<24x1xf32>,
    } else {
    }
    %c0 = arith.constant 0 : index
    %c0_1 = arith.constant 0 : index
    %3 = vector.load %arg7[%c0, %c0_1] : memref<24x1xf32, #tpu.memory_space<vmem>>, vector<24x1xf32>
    %c0_2 = arith.constant 0 : index
    %c0_3 = arith.constant 0 : index
    %4 = vector.load %arg2[%c0_2, %c0_3] : memref<24x256xf32, #tpu.memory_space<vmem>>, vector<24x256xf32>
    %cst = arith.constant dense<0.000000e+00> : vector<24xf32>
    %5 = vector.multi_reduction <add>, %4, %cst [1] : vector<24x256xf32> to vector<24xf32>
    %6 = vector.shape_cast %5 : vector<24xf32> to vector<24x1xf32>
    %7 = arith.addf %3, %6 : vector<24x1xf32>
    %c0_4 = arith.constant 0 : index
    %c0_5 = arith.constant 0 : index
    %8 = vector.load %arg7[%c0_4, %c0_5] : memref<24x1xf32, #tpu.memory_space<vmem>>, vector<24x1xf32>
    tpu.vector_store %arg7[%c0_4, %c0_5], %7 {strides = array<i32>} : memref<24x1xf32, #tpu.memory_space<vmem>>, vector<24x1xf32>,
    %c0_i32_6 = arith.constant 0 : i32
    %9 = arith.cmpi eq, %arg1, %c0_i32_6 : i32
    %10 = arith.extui %9 : i1 to i32
    %c0_i32_7 = arith.constant 0 : i32
    %11 = arith.cmpi ne, %10, %c0_i32_7 : i32
    scf.if %11 {
      %c0_8 = arith.constant 0 : index
      %c0_9 = arith.constant 0 : index
      %12 = vector.load %arg7[%c0_8, %c0_9] : memref<24x1xf32, #tpu.memory_space<vmem>>, vector<24x1xf32>
      %c0_10 = arith.constant 0 : index
      %c0_11 = arith.constant 0 : index
      %13 = vector.load %arg4[%c0_10, %c0_11] : memref<24x128xf32, #tpu.memory_space<vmem>>, vector<24x128xf32>
      %14 = vector.broadcast %12 : vector<24x1xf32> to vector<24x128xf32>
      %15 = arith.mulf %14, %13 : vector<24x128xf32>
      %c0_12 = arith.constant 0 : index
      %c0_13 = arith.constant 0 : index
      %16 = vector.load %arg3[%c0_12, %c0_13] : memref<8x24xf32, #tpu.memory_space<vmem>>, vector<8x24xf32>
      %cst_14 = arith.constant dense<0.000000e+00> : vector<8x128xf32>
      %17 = tpu.matmul %16, %15, %cst_14 {dimension_numbers = #tpu.dot_dimension_numbers<[1], [0], [0], [1], [0, 0, 1, 1], [], []>} : vector<8x24xf32>, vector<24x128xf32>, vector<8x128xf32> -> vector<8x128xf32>
      %c0_15 = arith.constant 0 : index
      %c0_16 = arith.constant 0 : index
      %18 = vector.load %arg5[%c0_15, %c0_16] : memref<1x128xf32, #tpu.memory_space<vmem>>, vector<1x128xf32>
      %19 = vector.broadcast %18 : vector<1x128xf32> to vector<8x128xf32>
      %20 = arith.addf %17, %19 : vector<8x128xf32>
      %c0_17 = arith.constant 0 : index
      %c0_18 = arith.constant 0 : index
      %21 = vector.load %arg6[%c0_17, %c0_18] : memref<8x128xf32, #tpu.memory_space<vmem>>, vector<8x128xf32>
      tpu.vector_store %arg6[%c0_17, %c0_18], %20 {strides = array<i32>} : memref<8x128xf32, #tpu.memory_space<vmem>>, vector<8x128xf32>,
    } else {
    }
    return
  }
  func.func @transform_0(%arg0: i32, %arg1: i32) -> (i32, i32) {
    %c0_i32 = arith.constant 0 : i32
    return %arg0, %arg1 : i32, i32
  }
  func.func @transform_1(%arg0: i32, %arg1: i32) -> (i32, i32) {
    %c0_i32 = arith.constant 0 : i32
    %c0_i32_0 = arith.constant 0 : i32
    %c0_i32_1 = arith.constant 0 : i32
    return %c0_i32, %c0_i32_0 : i32, i32
  }
  func.func @transform_2(%arg0: i32, %arg1: i32) -> (i32, i32) {
    %c0_i32 = arith.constant 0 : i32
    %c0_i32_0 = arith.constant 0 : i32
    %c0_i32_1 = arith.constant 0 : i32
    return %c0_i32, %c0_i32_0 : i32, i32
  }
  func.func @transform_3(%arg0: i32, %arg1: i32) -> (i32, i32) {
    %c0_i32 = arith.constant 0 : i32
    %c0_i32_0 = arith.constant 0 : i32
    %c0_i32_1 = arith.constant 0 : i32
    return %c0_i32, %c0_i32_0 : i32, i32
  }
  func.func @transform_4(%arg0: i32, %arg1: i32) -> (i32, i32) {
    %c0_i32 = arith.constant 0 : i32
    %c0_i32_0 = arith.constant 0 : i32
    return %arg0, %c0_i32 : i32, i32
  }
}

</mosaic_0001>

<bundles_post_ra>
// kernel: tpu_custom_call.1
= control target key start
LH: loop header
LB: loop body
LE: loop exit
PB: predicated region body
PF: predicated region fallthrough
CT: control target
= control target key end

     0   :  { %9 = vsyncpa [#allocation4], 0  ;;  %s344_s0 = inlined_call_operand.hbm [shape: f32[24,256], index: 0, kind: input, shape index: {}]   ;;  %s345_s1 = inlined_call_operand.hbm [shape: f32[8,24], index: 1, kind: input, shape index: {}]   ;;  %s346_s2 = inlined_call_operand.hbm [shape: f32[24,128], index: 2, kind: input, shape index: {}]   ;;  %s347_s3 = inlined_call_operand.vmem [shape: f32[1,128], index: 3, kind: input, shape index: {}]   ;;  %s348_s4 = inlined_call_operand.hbm [shape: f32[8,128], index: 4, kind: output, shape index: {}]  }
   0x1   :  { %10 = vsyncpa [#allocation7], 0  ;;  %s30_s17 = sshll.u32 %s345_s1, 4  ;;  %s31_s17 = int_to_ptr.hbm [resolvable:$true] %s30_s17 }
   0x2   :  { %11 = vsyncpa [#allocation5], 0  ;;  %s288_s18 = smov [#allocation6]   ;;  %s16_s22 = sshll.u32 %s344_s0, 4  ;;  %s17_s22 = int_to_ptr.hbm [resolvable:$true] %s16_s22 }
   0x3   :  { %s32_s19 = sshll.u32 %s288_s18, 4  ;;  %s289_s23 = smov [#allocation3]   ;;  %s33_s19 = int_to_ptr.vmem [resolvable:$true] %s32_s19 }
   0x4   :  { %35 = dma.hbm_to_vmem [thread:$0]  %s31_s17, 128, %s33_s19, [#allocation7]  }
   0x5   :  { %s18_s24 = sshll.u32 %s289_s23, 4  ;;  %s290_s25 = smov 256   ;;  %s19_s24 = int_to_ptr.vmem [resolvable:$true] %s18_s24 }
   0x6   :  { %s291_s26 = smov 16   ;;  %s40_s1 = sshll.u32 %s346_s2, 4  ;;  %s41_s1 = int_to_ptr.hbm [resolvable:$true] %s40_s1 }
   0x7   :  { %24 = dma.hbm_to_vmem [thread:$0]  %s17_s22, 768, %s19_s24, [#allocation4], %s290_s25, %s290_s25, %s291_s26  }
   0x8   :  { %s292_s29 = smov [#allocation8]   ;;  %s293_s5 = smov 128  }
   0x9   :  { %s42_s30 = sshll.u32 %s292_s29, 4  ;;  %s294_s6 = smov 8   ;;  %s43_s30 = int_to_ptr.vmem [resolvable:$true] %s42_s30 }
   0xa   :  { %48 = dma.hbm_to_vmem [thread:$0]  %s41_s1, 384, %s43_s30, [#allocation7], %s293_s5, %s293_s5, %s294_s6  }
   0xb   :  { %282 = dma.done.wait [#allocation4], 768  }
   0xc   :  { %283 = vsyncadd [#allocation4], 4294966528 }
   0xd   :  { %284 = dma.done.wait [#allocation7], 512  }
   0xe   :  { %285 = vsyncadd [#allocation7], 4294966784  ;;  %vm67_vm0 = vcmask 7168   ;;  %v295_v0 = vmov 0.0   ;;  %v78_v1 = vld [vmem:[#allocation3 + $0x20] sm:$0xff]  ;;  %v79_v2 = vld [vmem:[#allocation3 + $0x28] sm:$0xff] }
   0xf   :  { %70 = vst.msk [vmem:[#allocation2 + $0x10] sm:$0xff] %vm67_vm0, %v295_v0  ;;  %v86_v3 = vadd.f32 %v79_v2, %v78_v1  ;;  %v74_v4 = vld [vmem:[#allocation3] sm:$0xff]  ;;  %v75_v5 = vld [vmem:[#allocation3 + $0x8] sm:$0xff]  ;;  %v76_v7 = vld [vmem:[#allocation3 + $0x10] sm:$0xff]  ;;  %v296_v10 = vmov 0   ;;  %vm128_vm1 = vcmask 195584  }
  0x10   :  { %68 = vst.msk [vmem:[#allocation2] sm:$0xff] %vm67_vm0, %v295_v0  ;;  %v80_v6 = vadd.f32 %v75_v5, %v74_v4  ;;  %v77_v8 = vld [vmem:[#allocation3 + $0x18] sm:$0xff]  ;;  %182 = vset.pattern.permute.xlu1 %v296_v10  ;;  %183 = vset.pattern.permute.xlu2 %v296_v10  ;;  %v104_v24 = vld [vmem:[#allocation8 + $0x10] sm:$0xff]  ;;  %v103_v25 = vld [vmem:[#allocation8 + $0x8] sm:$0xff]  ;;  %s297_s7 = smov [#allocation9]   ;;  %s160_s11 = sshll.u32 %s348_s4, 4  ;;  %s161_s11 = int_to_ptr.hbm [resolvable:$true] %s160_s11 }
  0x11   :  { %69 = vst.msk [vmem:[#allocation2 + $0x8] sm:$0xff] %vm67_vm0, %v295_v0  ;;  %87 = vadd.xlane.f32.xlu0 %v86_v3  ;;  %v83_v9 = vadd.f32 %v77_v8, %v76_v7  ;;  %v102_v28 = vld [vmem:[#allocation8] sm:$0xff]  ;;  %v123_v32 = vld [vmem:[#allocation6] sm:$0xff]  ;;  %v185_v33 = vld [vmem:[%s347_s3] ss:$0 sm:$0xff]  ;;  %s158_s8 = sshll.u32 %s297_s7, 4  ;;  %s159_s8 = int_to_ptr.vmem [resolvable:$true] %s158_s8 }
  0x12   :  { %81 = vadd.xlane.f32.xlu1 %v80_v6  ;;  %184 = vset.pattern.permute.xlu0 %v296_v10 }
  0x16   :  { %v73_v11 = vld [vmem:[#allocation2 + $0x10] sm:$0xff] }
  0x17   :  { %v71_v12 = vld [vmem:[#allocation2] sm:$0xff] }
  0x18   :  { %v72_v17 = vld [vmem:[#allocation2 + $0x8] sm:$0xff] }
  0x19   :  { %84 = vadd.xlane.f32.xlu0 %v83_v9 }
  0x84   :  { %v88_v13 = vpop.xlane.xlu0 %87 }
  0x85   :  { %v91_v14 = vadd.f32 %v88_v13, %v73_v11  ;;  %v82_v15 = vpop.xlane.xlu1 %81 }
  0x86   :  { %v89_v16 = vadd.f32 %v82_v15, %v71_v12 }
  0x87   :  { %95 = vst.msk [vmem:[#allocation2 + $0x10] sm:$0xff] %vm67_vm0, %v91_v14 }
  0x88   :  { %93 = vst.msk [vmem:[#allocation2] sm:$0xff] %vm67_vm0, %v89_v16 }
  0x8c   :  { %v85_v18 = vpop.xlane.xlu0 %84 }
  0x8d   :  { %v90_v19 = vadd.f32 %v85_v18, %v72_v17 }
  0x8e   :  { %v101_v20 = vld [vmem:[#allocation2 + $0x10] sm:$0xff] }
  0x8f   :  { %117 = vperm.xlu1 %182, %v101_v20   ;;  %94 = vst.msk [vmem:[#allocation2 + $0x8] sm:$0xff] %vm67_vm0, %v90_v19  ;;  %v99_v22 = vld [vmem:[#allocation2] sm:$0xff] }
  0x96   :  { %v100_v21 = vld [vmem:[#allocation2 + $0x8] sm:$0xff] }
  0x97   :  { %112 = vperm.xlu2 %183, %v100_v21  }
  0x9f   :  { %107 = vperm.xlu2 %183, %v99_v22  }
  0xf1   :  { %v113_v23 = vpop.permute.xlu2 %112 }
  0xf2   :  { %v121_v30 = vmul.f32 %v113_v23, %v103_v25 }
  0xf9   :  { %v108_v29 = vpop.permute.xlu2 %107 }
  0xfa   :  { %v120_v31 = vmul.f32 %v108_v29, %v102_v28 }
 0x101   :  { %v118_v26 = vpop.permute.xlu1 %117 }
 0x102   :  { %v122_v27 = vmul.f32 %v118_v26, %v104_v24 }
 0x104   :  { %145 = vmatpush.msra.mxu0 %v122_v27 }
 0x106   :  { %146 = vmatpush.msra.mxu0 %v121_v30 }
 0x108   :  { %147 = vmatpush.msra.mxu0 %v120_v31 }
 0x109   :  { %171 = vmatmul.msk.f32.vlgmr.msra.gmra.mxu0 %vm128_vm1, %v123_v32 }
 0x186   :  { %v149_v34 = vpop.f32.mrf.mxu0 }
 0x187   :  { %v150_v35 = vadd.f32 %v185_v33, %v149_v34 }
 0x189   :  { %152 = vst [vmem:[#allocation9] sm:$0xff] %v150_v35 }
 0x18a   :  { %163 = dma.vmem_to_hbm [thread:$0]  %s159_s8, 128, %s161_s11, [#allocation5]  }
 0x18b   :  { %286 = dma.done.wait [#allocation5], 128  }
 0x18c   :  { %287 = vsyncadd [#allocation5], 4294967168 }
 0x18d   :  { %168 = vsyncpa [#allocation4], 1 }
 0x18e   :  { %169 = vsyncpa [#allocation7], 1 }
 0x18f   :  { %170 = vsyncpa [#allocation5], 1 }

</bundles_post_ra>
